<compile_context>
chip_gen: v5e
topology: v5e:2x2
jax: 0.10.0
libtpu: 0.0.40
codegen_flags: <defaults>
</compile_context>

<pallas_src>
import math
import functools

import jax
import jax.numpy as jnp
import numpy as np
from jax.experimental import pallas as pl
from jax.experimental.pallas import tpu as pltpu


_GELU_C = 0.7978845608028654  # sqrt(2 / pi)


def _mlp_kernel(x_ref, w1_ref, b1_ref, w2_ref, b2_ref, o_ref, *, compute_dtype):
    # x tile arrives in its native dtype; cast to the MXU compute dtype here
    # (avoids a separate wrapper-side cast pass over the activations).
    x = x_ref[...].astype(compute_dtype)

    # c_fc: (tm, C) @ (C, 4C) with f32 accumulation on the MXU.
    h = jnp.dot(x, w1_ref[...], preferred_element_type=jnp.float32)
    h = h + b1_ref[...]  # f32 bias, broadcast over rows

    # GELU (tanh approximation), restructured to minimize VALU ops:
    #   inner = sqrt(2/pi) * (h + 0.044715 * h^3); tanh lowers to the EUP slot.
    inner = (_GELU_C * h) * (1.0 + 0.044715 * (h * h))
    g = (0.5 * h) * (1.0 + jnp.tanh(inner))

    # c_proj: (tm, 4C) @ (4C, C) with f32 accumulation on the MXU.
    y = jnp.dot(g.astype(w2_ref.dtype), w2_ref[...],
                preferred_element_type=jnp.float32)
    y = y + b2_ref[...]

    # Single contiguous, lane-dense store of the whole output tile.
    o_ref[...] = y.astype(o_ref.dtype)


def mlp_forward(x, w_fc, b_fc, w_proj, b_proj, *,
                block_rows=256, compute_dtype=jnp.bfloat16):
    """Fused MLP forward.

    x:      (B, T, C)
    w_fc:   (C, 4C)    b_fc:   (4C,)
    w_proj: (4C, C)    b_proj: (C,)
    Returns (B, T, C) in x.dtype.

    block_rows: row-tile size. 256 matches the 256x256 MXU on v6e/v7x; use 128
    on v5e (4x 128x128 MXU).
    """
    B, T, C = x.shape
    H = w_fc.shape[1]
    assert w_fc.shape == (C, H)
    assert w_proj.shape == (H, C)

    N = B * T
    x2 = x.reshape(N, C)

    # Row tile: multiple of 16 (bf16 sublane packing), never below 16.
    tm = min(block_rows, N)
    tm = max(16, ((tm + 15) // 16) * 16)
    n_tiles = pl.cdiv(N, tm)
    n_pad = n_tiles * tm - N
    if n_pad:
        x2 = jnp.pad(x2, ((0, n_pad), (0, 0)))

    # Weights in the MXU compute dtype (cast once; they are resident across the
    # whole grid). Biases stay f32 and are added after the f32 accumulation.
    w1_c = w_fc.astype(compute_dtype)
    w2_c = w_proj.astype(compute_dtype)
    b1_r = b_fc.reshape(1, H).astype(jnp.float32)
    b2_r = b_proj.reshape(1, C).astype(jnp.float32)

    # --- VMEM budget: single-buffered weights + double-buffered x/out tiles +
    # f32 hidden intermediate + compute-dtype g scratch, with ~25% headroom. ---
    in_bytes = jnp.dtype(x.dtype).itemsize
    out_bytes = jnp.dtype(x.dtype).itemsize
    cd_bytes = jnp.dtype(compute_dtype).itemsize
    weight_bytes = (C * H + H * C) * cd_bytes + (H + C) * 4
    act_bytes = 2 * tm * C * in_bytes + 2 * tm * C * out_bytes
    scratch_bytes = tm * H * 4 + tm * H * cd_bytes
    vmem_limit = int(1.25 * (weight_bytes + act_bytes + scratch_bytes)) + (1 << 20)
    vmem_limit = min(max(vmem_limit, 16 << 20), 64 << 20)

    # Advisory cost so XLA schedules surrounding ops (residual add, LN) well.
    cost = pl.CostEstimate(
        flops=4 * N * C * H,
        transcendentals=N * H,
        bytes_accessed=N * C * (in_bytes + out_bytes) + weight_bytes,
    )

    kernel = functools.partial(_mlp_kernel, compute_dtype=compute_dtype)

    out = pl.pallas_call(
        kernel,
        out_shape=jax.ShapeDtypeStruct((n_tiles * tm, C), x.dtype),
        grid_spec=pltpu.PrefetchScalarGridSpec(
            num_scalar_prefetch=0,
            grid=(n_tiles,),
            in_specs=[
                # Activations: pipelined (default double-buffered) along rows.
                pl.BlockSpec((tm, C), lambda i: (i, 0)),
                # Constant-index resident operands: single buffer is enough.
                pl.BlockSpec((C, H), lambda i: (0, 0),
                             pipeline_mode=pl.Buffered(1)),   # W_fc
                pl.BlockSpec((1, H), lambda i: (0, 0),
                             pipeline_mode=pl.Buffered(1)),   # b_fc
                pl.BlockSpec((H, C), lambda i: (0, 0),
                             pipeline_mode=pl.Buffered(1)),   # W_proj
                pl.BlockSpec((1, C), lambda i: (0, 0),
                             pipeline_mode=pl.Buffered(1)),   # b_proj
            ],
            out_specs=pl.BlockSpec((tm, C), lambda i: (i, 0)),
        ),
        compiler_params=pltpu.CompilerParams(
            dimension_semantics=("parallel",),
            vmem_limit_bytes=vmem_limit,
        ),
        cost_estimate=cost,
    )(x2, w1_c, b1_r, w2_c, b2_r)

    if n_pad:
        out = out[:N]
    return out.reshape(B, T, C)


def mlp_reference(x, w_fc, b_fc, w_proj, b_proj, compute_dtype=jnp.bfloat16):
    """Pure-JAX reference matching the kernel's math (bf16 MXU inputs, f32 acc)."""
    B, T, C = x.shape
    H = w_fc.shape[1]
    x2 = x.reshape(-1, C).astype(compute_dtype)
    h = jnp.dot(x2, w_fc.astype(compute_dtype),
                preferred_element_type=jnp.float32) + b_fc.reshape(1, H)
    inner = (_GELU_C * h) * (1.0 + 0.044715 * (h * h))
    g = (0.5 * h) * (1.0 + jnp.tanh(inner))
    y = jnp.dot(g.astype(compute_dtype), w_proj.astype(compute_dtype),
                preferred_element_type=jnp.float32) + b_proj.reshape(1, C)
    return y.reshape(B, T, C).astype(x.dtype)


if __name__ == "__main__":
    # Small shapes consistent with the module: n_embd=32, hidden=4*32=128.
    B, T, C = 2, 16, 32
    H = 4 * C

    key = jax.random.PRNGKey(0)
    kx, k1, k2, k3, k4 = jax.random.split(key, 5)

    x = jax.random.normal(kx, (B, T, C), dtype=jnp.float32)

    # PyTorch nn.Linear default init: U(-1/sqrt(in), 1/sqrt(in)).
    # (NANOGPT_SCALE_INIT only changes initialization elsewhere, not forward.)
    bound_fc = 1.0 / math.sqrt(C)
    w_fc = jax.random.uniform(k1, (C, H), jnp.float32, -bound_fc, bound_fc)
    b_fc = jax.random.uniform(k2, (H,), jnp.float32, -bound_fc, bound_fc)
    bound_pr = 1.0 / math.sqrt(H)
    w_proj = jax.random.uniform(k3, (H, C), jnp.float32, -bound_pr, bound_pr)
    b_proj = jax.random.uniform(k4, (C,), jnp.float32, -bound_pr, bound_pr)

    # block_rows=16 so the toy N=32 case exercises a multi-step (pipelined) grid.
    y = mlp_forward(x, w_fc, b_fc, w_proj, b_proj, block_rows=16)
    y = jax.block_until_ready(y)

    y_ref = mlp_reference(x, w_fc, b_fc, w_proj, b_proj)
    np.testing.assert_allclose(np.asarray(y), np.asarray(y_ref),
                               rtol=5e-3, atol=5e-3)

    print("KERNEL_OK")
</pallas_src>

<mosaic_0001>
module attributes {stable_mosaic.version = 11 : i64} {
  func.func @_mlp_kernel(%arg0: i32, %arg1: memref<16x32xf32, #tpu.memory_space<vmem>>, %arg2: memref<32x128xbf16, #tpu.memory_space<vmem>>, %arg3: memref<1x128xf32, #tpu.memory_space<vmem>>, %arg4: memref<128x32xbf16, #tpu.memory_space<vmem>>, %arg5: memref<1x32xf32, #tpu.memory_space<vmem>>, %arg6: memref<16x32xf32, #tpu.memory_space<vmem>>) attributes {dimension_semantics = [#tpu.dimension_semantics<parallel>], iteration_bounds = array<i64: 2>, scalar_prefetch = 0 : i64, scratch_operands = 0 : i64, tpu.core_type = #tpu.core_type<tc>, window_params = [{transform_indices = @transform_0, window_bounds = array<i64: 16, 32>}, {pipeline_mode = #tpu.pipeline_mode<synchronous>, transform_indices = @transform_1, window_bounds = array<i64: 32, 128>}, {pipeline_mode = #tpu.pipeline_mode<synchronous>, transform_indices = @transform_2, window_bounds = array<i64: 1, 128>}, {pipeline_mode = #tpu.pipeline_mode<synchronous>, transform_indices = @transform_3, window_bounds = array<i64: 128, 32>}, {pipeline_mode = #tpu.pipeline_mode<synchronous>, transform_indices = @transform_4, window_bounds = array<i64: 1, 32>}, {transform_indices = @transform_5, window_bounds = array<i64: 16, 32>}]} {
    %c0 = arith.constant 0 : index
    %c0_0 = arith.constant 0 : index
    %0 = vector.load %arg1[%c0, %c0_0] : memref<16x32xf32, #tpu.memory_space<vmem>>, vector<16x32xf32>
    %1 = arith.truncf %0 : vector<16x32xf32> to vector<16x32xbf16>
    %c0_1 = arith.constant 0 : index
    %c0_2 = arith.constant 0 : index
    %2 = vector.load %arg2[%c0_1, %c0_2] : memref<32x128xbf16, #tpu.memory_space<vmem>>, vector<32x128xbf16>
    %cst = arith.constant dense<0.000000e+00> : vector<16x128xf32>
    %3 = tpu.matmul %1, %2, %cst {dimension_numbers = #tpu.dot_dimension_numbers<[1], [0], [0], [1], [0, 0, 1, 1], [], []>} : vector<16x32xbf16>, vector<32x128xbf16>, vector<16x128xf32> -> vector<16x128xf32>
    %c0_3 = arith.constant 0 : index
    %c0_4 = arith.constant 0 : index
    %4 = vector.load %arg3[%c0_3, %c0_4] : memref<1x128xf32, #tpu.memory_space<vmem>>, vector<1x128xf32>
    %5 = vector.broadcast %4 : vector<1x128xf32> to vector<16x128xf32>
    %6 = arith.addf %3, %5 : vector<16x128xf32>
    %cst_5 = arith.constant 0.797884583 : f32
    %7 = vector.broadcast %cst_5 : f32 to vector<16x128xf32>
    %8 = arith.mulf %7, %6 : vector<16x128xf32>
    %9 = arith.mulf %6, %6 : vector<16x128xf32>
    %cst_6 = arith.constant 4.471500e-02 : f32
    %10 = vector.broadcast %cst_6 : f32 to vector<16x128xf32>
    %11 = arith.mulf %10, %9 : vector<16x128xf32>
    %cst_7 = arith.constant 1.000000e+00 : f32
    %12 = vector.broadcast %cst_7 : f32 to vector<16x128xf32>
    %13 = arith.addf %12, %11 : vector<16x128xf32>
    %14 = arith.mulf %8, %13 : vector<16x128xf32>
    %cst_8 = arith.constant 5.000000e-01 : f32
    %15 = vector.broadcast %cst_8 : f32 to vector<16x128xf32>
    %16 = arith.mulf %15, %6 : vector<16x128xf32>
    %17 = math.tanh %14 : vector<16x128xf32>
    %cst_9 = arith.constant 1.000000e+00 : f32
    %18 = vector.broadcast %cst_9 : f32 to vector<16x128xf32>
    %19 = arith.addf %18, %17 : vector<16x128xf32>
    %20 = arith.mulf %16, %19 : vector<16x128xf32>
    %21 = arith.truncf %20 : vector<16x128xf32> to vector<16x128xbf16>
    %c0_10 = arith.constant 0 : index
    %c0_11 = arith.constant 0 : index
    %22 = vector.load %arg4[%c0_10, %c0_11] : memref<128x32xbf16, #tpu.memory_space<vmem>>, vector<128x32xbf16>
    %cst_12 = arith.constant dense<0.000000e+00> : vector<16x32xf32>
    %23 = tpu.matmul %21, %22, %cst_12 {dimension_numbers = #tpu.dot_dimension_numbers<[1], [0], [0], [1], [0, 0, 1, 1], [], []>} : vector<16x128xbf16>, vector<128x32xbf16>, vector<16x32xf32> -> vector<16x32xf32>
    %c0_13 = arith.constant 0 : index
    %c0_14 = arith.constant 0 : index
    %24 = vector.load %arg5[%c0_13, %c0_14] : memref<1x32xf32, #tpu.memory_space<vmem>>, vector<1x32xf32>
    %25 = vector.broadcast %24 : vector<1x32xf32> to vector<16x32xf32>
    %26 = arith.addf %23, %25 : vector<16x32xf32>
    %c0_15 = arith.constant 0 : index
    %c0_16 = arith.constant 0 : index
    %27 = vector.load %arg6[%c0_15, %c0_16] : memref<16x32xf32, #tpu.memory_space<vmem>>, vector<16x32xf32>
    tpu.vector_store %arg6[%c0_15, %c0_16], %26 {strides = array<i32>} : memref<16x32xf32, #tpu.memory_space<vmem>>, vector<16x32xf32>,
    return
  }
  func.func @transform_0(%arg0: i32) -> (i32, i32) {
    %c0_i32 = arith.constant 0 : i32
    %c0_i32_0 = arith.constant 0 : i32
    return %arg0, %c0_i32 : i32, i32
  }
  func.func @transform_1(%arg0: i32) -> (i32, i32) {
    %c0_i32 = arith.constant 0 : i32
    %c0_i32_0 = arith.constant 0 : i32
    %c0_i32_1 = arith.constant 0 : i32
    return %c0_i32, %c0_i32_0 : i32, i32
  }
  func.func @transform_2(%arg0: i32) -> (i32, i32) {
    %c0_i32 = arith.constant 0 : i32
    %c0_i32_0 = arith.constant 0 : i32
    %c0_i32_1 = arith.constant 0 : i32
    return %c0_i32, %c0_i32_0 : i32, i32
  }
  func.func @transform_3(%arg0: i32) -> (i32, i32) {
    %c0_i32 = arith.constant 0 : i32
    %c0_i32_0 = arith.constant 0 : i32
    %c0_i32_1 = arith.constant 0 : i32
    return %c0_i32, %c0_i32_0 : i32, i32
  }
  func.func @transform_4(%arg0: i32) -> (i32, i32) {
    %c0_i32 = arith.constant 0 : i32
    %c0_i32_0 = arith.constant 0 : i32
    %c0_i32_1 = arith.constant 0 : i32
    return %c0_i32, %c0_i32_0 : i32, i32
  }
  func.func @transform_5(%arg0: i32) -> (i32, i32) {
    %c0_i32 = arith.constant 0 : i32
    %c0_i32_0 = arith.constant 0 : i32
    return %arg0, %c0_i32 : i32, i32
  }
}

</mosaic_0001>

<bundles_post_ra>
// kernel: tpu_custom_call.1
= control target key start
LH: loop header
LB: loop body
LE: loop exit
PB: predicated region body
PF: predicated region fallthrough
CT: control target
= control target key end

     0   :  { %10 = vsyncpa [#allocation3], 0  ;;  %s779_s0 = inlined_call_operand.vmem [shape: f32[32,32], index: 0, kind: input, shape index: {}]   ;;  %s780_s1 = inlined_call_operand.vmem [shape: bf16[32,128], index: 1, kind: input, shape index: {}]   ;;  %s781_s2 = inlined_call_operand.vmem [shape: f32[1,128], index: 2, kind: input, shape index: {}]   ;;  %s782_s3 = inlined_call_operand.vmem [shape: bf16[128,32], index: 3, kind: input, shape index: {}]   ;;  %s783_s4 = inlined_call_operand.vmem [shape: f32[1,32], index: 4, kind: input, shape index: {}]   ;;  %s784_s5 = inlined_call_operand.hbm [shape: f32[32,32], index: 5, kind: output, shape index: {}]  }
   0x1   :  { %12 = vsyncpa [#allocation3 + $0x1], 0  ;;  %s656_s18 = smov 0   ;;  %s658_s19 = smov 0  }
   0x2   :  { %s660_s20 = smov 0   ;;  %s662_s21 = smov 0  }
   0x3 LB: > { %s677_s22 = sadd.s32 4294967295, %s622_s21   ;;  %s449_s23 = sadd.s32 4294967294, %s622_s21   ;;  %s622_s21 = sphi %s662_s21, %s790_s21   ;;  %s618_s20 = sphi %s660_s20, %s789_s20   ;;  %s614_s19 = sphi %s658_s19, %s788_s19   ;;  %s610_s18 = sphi %s656_s18, %s787_s18  }
   0x4   : > { %s681_s24 = sadd.s32 1, %s622_s21   ;;  %s135_s25 = sadd.s32 1, %s618_s20 }
   0x5   : > { %s132_s26 = ssub.s32 %s622_s21, %s681_s24  ;;  %p145_p0 = scmp.ne.s32.totalorder %s618_s20, %s614_s19 }
   0x6   : > { %p133_p1 = scmp.eq.s32.totalorder %s132_s26, 0  ;;  %p146_p2 = scmp.eq.s32.totalorder %s677_s22, 1 }
   0x7   : > { %p151_p3 = scmp.ne.s32.totalorder %s614_s19, %s610_s18  ;;  %p152_p4 = scmp.eq.s32.totalorder %s449_s23, 1 }
   0x8   : > { %s692_s27 = scalar_select %p133_p1, %s618_s20, %s135_s25  }
   0x9   : > { %p694_p5 = por %p146_p2, %p145_p0  ;;  %p698_p6 = por %p152_p4, %p151_p3 }
   0xa   : > { %p452_p7 = scmp.ge.s32.totalorder %s622_s21, 1  ;;  %p191_p8 = scmp.lt.s32.totalorder %s622_s21, 3 }
   0xc   : > { %p192_p9 = pnand %p452_p7, %p191_p8 }
   0xd   : > { %s454_s7 = sshll.u32 (!%p192_p9), %s677_s22, 1  ;;  %s216_s16 = sand.u32 (!%p192_p9), 1, %s614_s19  }
   0xe   : > { %195 = sbr.rel (%p192_p9) target bundleno = 324 (0x144), region = 40  ;;  %p220_p10 = scmp.lt.s32.totalorder (!%p192_p9), %s454_s7, 3 }
   0xf   : > { %s453_s17 = sshll.u32 (!%p192_p9), %s216_s16, 4  ;;  %s512_s26 = sshll.u32 (!%p192_p9), %s677_s22, 4 }
  0x10   : > { %s218_s8 = scalar_lea.vmem (!%p192_p9), [#allocation2], %s453_s17  ;;  %s372_s11 = scalar_lea.sflag (!%p192_p9), [#allocation3], %s216_s16 }
  0x11   : > { %s384_s9 = sshll.u32 (!%p192_p9), %s218_s8, 4  ;;  %s580_s15 = scalar_lea.hbm (!%p192_p9), %s784_s5, 32  ;;  %s385_s9 = int_to_ptr.vmem [resolvable:$true] %s384_s9 }
  0x13   : > { %v503_v0 = vld [vmem:[%s780_s1 + $0x8] sm:$0xff]  ;;  %v502_v1 = vld [vmem:[%s780_s1] sm:$0xff]  ;;  %s792_s7 = smov (!%p220_p10, %s454_s7), 3  ;;  %vm250_vm0 = vcmask 261120   ;;  %v511_v5 = vld [vmem:[%s782_s3 + $0x38] sm:$0xff] }
  0x14   : > { %260 = vmatpush.bf16.msra.mxu0 %v503_v0  ;;  %s455_s10 = sshll.u32 %s792_s7, 3  ;;  %355 = vmatpush.bf16.msra.mxu1 %v511_v5  ;;  %v510_v6 = vld [vmem:[%s782_s3 + $0x30] sm:$0xff]  ;;  %v509_v7 = vld [vmem:[%s782_s3 + $0x28] sm:$0xff]  ;;  %v508_v8 = vld [vmem:[%s782_s3 + $0x20] sm:$0xff]  ;;  %s383_s7 = scalar_lea.hbm %s784_s5, %s512_s26 }
  0x15   : > { %s223_s13 = scalar_lea.vmem %s779_s0, %s455_s10  ;;  %v507_v9 = vld [vmem:[%s782_s3 + $0x18] sm:$0xff]  ;;  %v506_v10 = vld [vmem:[%s782_s3 + $0x10] sm:$0xff]  ;;  %v505_v11 = vld [vmem:[%s782_s3 + $0x8] sm:$0xff]  ;;  %s386_s10 = sshll.u32 %s383_s7, 4  ;;  %s387_s10 = int_to_ptr.hbm [resolvable:$true] %s386_s10 }
  0x16   : > { %v227_v2 = vld [vmem:[%s223_s13] sm:$0xff]  ;;  %v228_v3 = vld [vmem:[%s223_s13 + $0x8] sm:$0xff]  ;;  %s574_s22 = sshra.s32 %s387_s10, 4  ;;  %s575_s22 = int_to_ptr.hbm [resolvable:$true] %s574_s22 }
  0x17   : > { %v229_v4 = vpack.c.bf16 %v228_v3, %v227_v2  ;;  %v504_v12 = vld [vmem:[%s782_s3] sm:$0xff]  ;;  %s576_s12 = scalar_lea.hbm %s575_s22, 16  ;;  %p581_p0 = scmp.lt.s32.totalorder %s575_s22, %s784_s5 }
  0x18   : > { %261 = vmatpush.bf16.msra.mxu0 %v502_v1  ;;  %356 = vmatpush.bf16.msra.mxu1 %v510_v6  ;;  %v554_v13 = vld [vmem:[%s781_s2] ss:$0 sm:$0xff]  ;;  %p577_p11 = scmp.ne.s32.totalorder %s575_s22, %s576_s12  ;;  %p582_p1 = scmp.lt.s32.totalorder %s580_s15, %s576_s12 }
  0x19   : > { %v555_v37 = vld [vmem:[%s783_s4] ss:$0 sm:$0xff] }
  0x1a   : > { %p578_p12 = pnand %p577_p11, %p694_p5  ;;  %p583_p2 = por %p582_p1, %p581_p0 }
  0x1b   : > { %464 = vmatmul.msk.bf16.vlgmr.msra.gmra.mxu0 %vm250_vm0, %v229_v4 }
  0x1c   : > { %357 = vmatpush.bf16.msra.mxu1 %v509_v7  ;;  %p579_p13 = pneg %p578_p12 }
  0x1e   : > { %p584_p3 = pnand %p583_p2, %p579_p13 }
  0x20   : > { %358 = vmatpush.bf16.msra.mxu1 %v508_v8 }
  0x24   : > { %359 = vmatpush.bf16.msra.mxu1 %v507_v9 }
  0x28   : > { %360 = vmatpush.bf16.msra.mxu1 %v506_v10 }
  0x2c   : > { %361 = vmatpush.bf16.msra.mxu1 %v505_v11 }
  0x30   : > { %362 = vmatpush.bf16.msra.mxu1 %v504_v12 }
  0x98   : > { %v263_v14 = vpop.f32.mrf.mxu0 }
  0x99   : > { %v264_v15 = vadd.f32 %v554_v13, %v263_v14 }
  0x9b   : > { %v270_v16 = vmul.f32 %v264_v15, %v264_v15  ;;  %v268_v20 = vmul.f32 0.7978846, %v264_v15  ;;  %v278_v31 = vmul.f32 0.5, %v264_v15 }
  0x9d   : > { %v272_v17 = vmul.f32 0.044715, %v270_v16 }
  0x9f   : > { %v274_v18 = vadd.f32 1.0, %v272_v17 }
  0xa0   : > { %v265_v19 = vpop.f32.mrf.mxu0 }
  0xa1   : > { %v266_v21 = vadd.f32 %v554_v13, %v265_v19  ;;  %v276_v22 = vmul.f32 %v274_v18, %v268_v20 }
  0xa3   : > { %v271_v23 = vmul.f32 %v266_v21, %v266_v21  ;;  %v269_v25 = vmul.f32 0.7978846, %v266_v21  ;;  %556 = vtanh.f32 %v276_v22  ;;  %v279_v32 = vmul.f32 0.5, %v266_v21 }
  0xa5   : > { %v273_v24 = vmul.f32 0.044715, %v271_v23 }
  0xa7   : > { %v275_v26 = vadd.f32 1.0, %v273_v24 }
  0xa9   : > { %v277_v27 = vmul.f32 %v275_v26, %v269_v25  ;;  %v557_v28 = vpop.eup %556 }
  0xaa   : > { %v282_v29 = vadd.f32 1.0, %v557_v28 }
  0xab   : > { %558 = vtanh.f32 %v277_v27 }
  0xac   : > { %v284_v34 = vmul.f32 %v282_v29, %v278_v31 }
  0xb1   : > { %v559_v30 = vpop.eup %558 }
  0xb2   : > { %v283_v33 = vadd.f32 1.0, %v559_v30 }
  0xb4   : > { %v285_v35 = vmul.f32 %v283_v33, %v279_v32 }
  0xb6   : > { %v286_v36 = vpack.c.bf16 %v285_v35, %v284_v34 }
  0xb8   : > { %363 = vmatmul.bf16.vlgmr.msra.gmra.mxu1 %v286_v36 }
 0x135   : > { %v364_v38 = vpop.f32.mrf.mxu1 }
 0x136   : > { %v365_v39 = vadd.f32 %v555_v37, %v364_v38 }
 0x138   : > { %369 = vst.msk [vmem:[%s218_s8] sm:$0xff] %vm250_vm0, %v365_v39 }
 0x13d   : > { %v366_v40 = vpop.f32.mrf.mxu1 }
 0x13e   : > { %v367_v41 = vadd.f32 %v555_v37, %v366_v40 }
 0x140   : > { %370 = vst.msk [vmem:[%s218_s8 + $0x8] sm:$0xff] %vm250_vm0, %v367_v41 }
 0x141   : > { %587 = shalt.err (!%p584_p3)
}
 0x142   : > { %s624_s16 = smov 128   ;;  %s625_s25 = smov 8  }
 0x143   : > { %513 = dma.vmem_to_hbm [thread:$0]  (%p694_p5), %s385_s9, 256, %s387_s10, %s372_s11, %s624_s16, %s624_s16, %s625_s25  }
 0x144 PF: > { %p519_p4 = scmp.ge.s32.totalorder %s622_s21, 2  ;;  %s401_s26 = sand.u32 1, %s610_s18  }
 0x145   : > { %s402_s30 = scalar_lea.sflag [#allocation3], %s401_s26 }
 0x146   : > { %p516_p7 = pnand %p519_p4, %p698_p6 }
 0x148   : > { %p517_p8 = pneg %p516_p7 }
 0x14a   : > { %605 = dma.done.wait (%p517_p8), %s402_s30, 256  }
 0x14b   : > { %607 = vsyncadd (%p517_p8), %s402_s30, 4294967040  ;;  %p15_p9 = scmp.ge.s32.totalorder %s681_s24, 4   ;;  %s787_s18 = smov %s614_s19 }
 0x14c   : > { %s788_s19 = smov %s618_s20  ;;  %s789_s20 = smov %s692_s27 }
 0x14d   : > { %s790_s21 = smov %s681_s24  ;;  %17 = sbr.rel (!%p15_p9) target bundleno = 3 (0x3), region = 75 }
 0x152   :  { %408 = vsyncpa [#allocation3], 1 }
 0x153   :  { %410 = vsyncpa [#allocation3 + $0x1], 1 }

</bundles_post_ra>
